<compile_context>
chip_gen: v7x
topology: tpu7x:2x2x1
jax: 0.10.0
libtpu: 0.0.40
codegen_flags: <defaults>
</compile_context>

<pallas_src>
import math

import numpy as np
import jax
import jax.numpy as jnp
from jax.experimental import pallas as pl
from jax.experimental.pallas import tpu as pltpu

_MIB = 1024 * 1024


def _physical_vmem_bytes():
    """Best-effort per-core VMEM capacity; conservative fallback = 64 MiB (v7x)."""
    try:
        info = pltpu.get_tpu_info()
        for attr in ("vmem_capacity_bytes", "vmem_bytes", "vmem_size_bytes"):
            v = getattr(info, attr, None)
            if isinstance(v, int) and v > 0:
                return v
    except Exception:
        pass
    return 64 * _MIB


def _softsort_kernel(inv_tau_ref, x_ref, o_ref):
    # inv_tau_ref: (1,) scalar-prefetch parameter in SMEM (already 1/tau).
    # x_ref / o_ref: (TR, H) VMEM tiles; softmax over the last (lane) axis.
    inv_tau = inv_tau_ref[0]
    z = x_ref[...].astype(jnp.float32) * inv_tau     # VPU multiply, no divide
    m = jnp.max(z, axis=-1, keepdims=True)           # XLU cross-lane reduce
    e = jnp.exp(z - m)                               # EUP
    s = jnp.sum(e, axis=-1, keepdims=True)           # XLU cross-lane reduce
    r = pl.reciprocal(s, approx=True)                # EUP vrcp (nearly free)
    r = r * (2.0 - s * r)                            # one Newton step -> ~1e-6 rel err
    o_ref[...] = (e * r).astype(o_ref.dtype)


def _select_tiling(R, H, dtype):
    """Pick the row-tile TR and an explicit VMEM limit for pallas_call."""
    itemsize = np.dtype(dtype).itemsize
    # Sublane packing: 8 rows/vreg for 4B dtypes, 16 for 2B, 32 for 1B.
    sub = max(8, 32 // max(1, itemsize))

    physical = _physical_vmem_bytes()
    budget = int(physical * 0.6)      # headroom: ~38 MiB on v7x, ~77 MiB v5e/v6e

    # VMEM per row in a block: double-buffered input + output tiles plus
    # ~3 full-width f32 temporaries (z, e, normalized result).
    per_row = 2 * H * itemsize + 2 * H * itemsize + 3 * H * 4

    # Byte-based target: ~4 MiB input blocks (review: 2-8 MiB sweet spot).
    target_block_bytes = 4 * _MIB
    tr_target = max(sub, (target_block_bytes // max(1, H * itemsize)) // sub * sub)
    tr_budget = max(sub, (budget // per_row) // sub * sub)
    tr = min(tr_target, tr_budget)

    if R < sub:
        tr = R                                   # block == full row extent (allowed)
    else:
        tr = min(tr, ((R + sub - 1) // sub) * sub)   # don't tile past the data
        # Keep >= 2 grid steps so v7x's two TensorCores both get work.
        while tr > sub and -(-R // tr) < 2:
            tr = max(sub, ((tr // 2) // sub) * sub)

    # Explicit VMEM limit = estimated usage + headroom (review item).
    est = 4 * tr * H * itemsize + 3 * tr * H * 4
    vmem_limit = int(min(physical * 0.9, max(est + 4 * _MIB, 16 * _MIB)))
    return tr, vmem_limit


def trainable_soft_sort(scores, tau):
    """softmax(scores / tau, axis=-1). scores: [..., H]; tau: scalar parameter."""
    *lead, H = scores.shape
    R = math.prod(lead) if lead else 1
    x = scores.reshape(R, H)     # reshape is free (no data movement)

    TR, vmem_limit = _select_tiling(R, H, scores.dtype)
    grid = (pl.cdiv(R, TR),)     # ragged last block handled by Pallas store masking

    # 1/tau computed once here; delivered via SMEM scalar prefetch.
    inv_tau = (1.0 / jnp.asarray(tau, jnp.float32)).reshape((1,))

    # TODO(synk): if H is not a multiple of 128, pad H once at the model level
    # (and mask padded lanes with -inf in-kernel) to keep stores lane-dense;
    # here block last dim == full H, which is correct but uses masked stores.
    out = pl.pallas_call(
        _softsort_kernel,
        out_shape=jax.ShapeDtypeStruct((R, H), scores.dtype),
        grid_spec=pltpu.PrefetchScalarGridSpec(
            num_scalar_prefetch=1,                       # inv_tau lands in SMEM
            grid=grid,
            in_specs=[
                pl.BlockSpec((TR, H), lambda i, inv_tau_ref: (i, 0)),
            ],
            out_specs=pl.BlockSpec((TR, H), lambda i, inv_tau_ref: (i, 0)),
        ),
        compiler_params=pltpu.CompilerParams(
            dimension_semantics=("parallel",),
            vmem_limit_bytes=vmem_limit,
        ),
    )(inv_tau, x)

    return out.reshape(scores.shape)


if __name__ == "__main__":
    key = jax.random.PRNGKey(0)
    B, S, H = 2, 8, 128
    scores = jax.random.normal(key, (B, S, H), dtype=jnp.float32)

    # deterministic parameter init, matching nn.Parameter(torch.tensor(0.1))
    init_tau = jnp.float32(0.1)

    out = trainable_soft_sort(scores, init_tau)
    out = jax.block_until_ready(out)

    # sanity check vs plain-JAX reference
    ref = jax.nn.softmax(scores / init_tau, axis=-1)
    assert out.shape == scores.shape
    assert jnp.allclose(out, ref, atol=1e-5, rtol=1e-5)

    print("KERNEL_OK")
</pallas_src>

<mosaic_0001>
module attributes {stable_mosaic.version = 11 : i64} {
  func.func @_softsort_kernel(%arg0: i32, %arg1: memref<1xf32, #tpu.memory_space<smem>>, %arg2: memref<8x128xf32, #tpu.memory_space<vmem>>, %arg3: memref<8x128xf32, #tpu.memory_space<vmem>>) attributes {dimension_semantics = [#tpu.dimension_semantics<parallel>], iteration_bounds = array<i64: 2>, scalar_prefetch = 1 : i64, scratch_operands = 0 : i64, tpu.core_type = #tpu.core_type<tc>, window_params = [{transform_indices = @transform_0, window_bounds = array<i64: 8, 128>}, {transform_indices = @transform_1, window_bounds = array<i64: 8, 128>}]} {
    %c0 = arith.constant 0 : index
    %0 = memref.load %arg1[%c0] : memref<1xf32, #tpu.memory_space<smem>>
    %c0_0 = arith.constant 0 : index
    %c0_1 = arith.constant 0 : index
    %1 = vector.load %arg2[%c0_0, %c0_1] : memref<8x128xf32, #tpu.memory_space<vmem>>, vector<8x128xf32>
    %2 = vector.broadcast %0 : f32 to vector<8x128xf32>
    %3 = arith.mulf %1, %2 : vector<8x128xf32>
    %cst = arith.constant dense<0xFF800000> : vector<8xf32>
    %4 = vector.multi_reduction <maximumf>, %3, %cst [1] : vector<8x128xf32> to vector<8xf32>
    %5 = vector.shape_cast %4 : vector<8xf32> to vector<8x1xf32>
    %6 = vector.broadcast %5 : vector<8x1xf32> to vector<8x128xf32>
    %7 = arith.subf %3, %6 : vector<8x128xf32>
    %8 = math.exp %7 : vector<8x128xf32>
    %cst_2 = arith.constant dense<0.000000e+00> : vector<8xf32>
    %9 = vector.multi_reduction <add>, %8, %cst_2 [1] : vector<8x128xf32> to vector<8xf32>
    %10 = vector.shape_cast %9 : vector<8xf32> to vector<8x1xf32>
    %11 = tpu.reciprocal %10 {approx = true} : vector<8x1xf32> -> vector<8x1xf32>
    %12 = arith.mulf %10, %11 : vector<8x1xf32>
    %cst_3 = arith.constant 2.000000e+00 : f32
    %13 = vector.broadcast %cst_3 : f32 to vector<8x1xf32>
    %14 = arith.subf %13, %12 : vector<8x1xf32>
    %15 = arith.mulf %11, %14 : vector<8x1xf32>
    %16 = vector.broadcast %15 : vector<8x1xf32> to vector<8x128xf32>
    %17 = arith.mulf %8, %16 : vector<8x128xf32>
    %c0_4 = arith.constant 0 : index
    %c0_5 = arith.constant 0 : index
    %18 = vector.load %arg3[%c0_4, %c0_5] : memref<8x128xf32, #tpu.memory_space<vmem>>, vector<8x128xf32>
    tpu.vector_store %arg3[%c0_4, %c0_5], %17 {strides = array<i32>} : memref<8x128xf32, #tpu.memory_space<vmem>>, vector<8x128xf32>,
    return
  }
  func.func @transform_0(%arg0: i32, %arg1: memref<1xf32, #tpu.memory_space<smem>>) -> (i32, i32) {
    %c0_i32 = arith.constant 0 : i32
    %c0_i32_0 = arith.constant 0 : i32
    return %arg0, %c0_i32 : i32, i32
  }
  func.func @transform_1(%arg0: i32, %arg1: memref<1xf32, #tpu.memory_space<smem>>) -> (i32, i32) {
    %c0_i32 = arith.constant 0 : i32
    %c0_i32_0 = arith.constant 0 : i32
    return %arg0, %c0_i32 : i32, i32
  }
}

</mosaic_0001>

<bundles_post_ra>
// kernel: tpu_custom_call.1
= control target key start
LH: loop header
LB: loop body
LE: loop exit
PB: predicated region body
PF: predicated region fallthrough
CT: control target
= control target key end

     0   :  { %s576_s0 = inlined_call_operand.<no memory space> [shape: f32[1], index: 0, kind: input, shape index: {}]   ;;  %s577_s1 = inlined_call_operand.hbm [shape: f32[16,128], index: 1, kind: input, shape index: {}]   ;;  %s578_s2 = inlined_call_operand.hbm [shape: f32[16,128], index: 2, kind: output, shape index: {}]  }
   0x1   :  { %7 = sst [smem:[#allocation3]] %s576_s0 }
   0x2   :  { %8 = vsyncpa [#allocation5], 0 }
   0x3   :  { %10 = vsyncpa [#allocation5 + $0x1], 0 }
   0x4   :  { %11 = vsyncpa [#allocation6], 0 }
   0x5   :  { %13 = vsyncpa [#allocation6 + $0x1], 0  ;;  %s415_s11 = smov 0   ;;  %s417_s12 = smov 0  }
   0x6   :  { %s419_s13 = smov 0   ;;  %s421_s14 = smov 0  }
   0x7 LB: > { %s436_s0 = sadd.s32 4294967295, %s393_s14   ;;  %s235_s15 = sadd.s32 4294967294, %s393_s14   ;;  %s393_s14 = sphi %s421_s14, %s593_s14   ;;  %s389_s13 = sphi %s419_s13, %s592_s13   ;;  %s385_s12 = sphi %s417_s12, %s591_s12   ;;  %s381_s11 = sphi %s415_s11, %s590_s11  }
   0x8   : > { %s440_s16 = sadd.s32 1, %s393_s14   ;;  %s26_s17 = sadd.s32 1, %s389_s13 }
   0x9   : > { %s23_s18 = ssub.s32 %s393_s14, %s440_s16  ;;  %p33_p0 = scmp.ne.s32.totalorder %s389_s13, %s385_s12 }
   0xa   : > { %p24_p1 = scmp.eq.s32.totalorder %s23_s18, 0  ;;  %p34_p2 = scmp.eq.s32.totalorder %s393_s14, 0 }
   0xb   : > { %p39_p3 = scmp.ne.s32.totalorder %s385_s12, %s381_s11  ;;  %p40_p4 = scmp.eq.s32.totalorder %s436_s0, 0 }
   0xc   : > { %s452_s19 = scalar_select %p24_p1, %s389_s13, %s26_s17  }
   0xd   : > { %p454_p5 = por %p34_p2, %p33_p0  ;;  %p458_p6 = por %p40_p4, %p39_p3 }
   0xe   : > { %p63_p7 = scmp.eq.s32.totalorder %s436_s0, 1  ;;  %p69_p8 = scmp.eq.s32.totalorder %s235_s15, 1 }
   0xf   : > { %p259_p10 = scmp.lt.s32.totalorder %s393_s14, 2  ;;  %s89_s24 = sand.u32 1, %s389_s13  }
  0x10   : > { %p465_p11 = por %p63_p7, %p33_p0  ;;  %p469_p12 = por %p69_p8, %p39_p3 }
  0x11   : > { %s239_s25 = sshll.u32 %s393_s14, 7  ;;  %s238_s26 = sshll.u32 %s89_s24, 3 }
  0x12   : > { %s582_s22 = scalar_select %p465_p11, 1, 0 }
  0x13   : > { %s583_s23 = scalar_select %p469_p12, 1, 0 }
  0x14   : > { %s478_s29 = scalar_lea.hbm %s577_s1, %s239_s25  ;;  %s93_s30 = scalar_lea.vmem [#allocation4], %s238_s26 }
  0x15   : > { %s100_s3 = sshll.u32 %s93_s30, 4  ;;  %p482_p13 = pnand %p259_p10, %p454_p5  ;;  %s486_s3 = int_to_ptr.vmem [resolvable:$true] %s100_s3 }
  0x16   : > { %s90_s5 = scalar_lea.sflag [#allocation5], %s89_s24  ;;  %s297_s6 = scalar_lea.hbm %s478_s29, 128 }
  0x17   : > { %p298_p2 = scmp.ne.s32.totalorder %s478_s29, %s297_s6  ;;  %p299_p3 = pneg %p482_p13 }
  0x18   : > { %s302_s9 = scalar_lea.hbm %s577_s1, 256  ;;  %p303_p5 = scmp.lt.u32.totalorder %s478_s29, %s577_s1 }
  0x19   : > { %p300_p4 = pnand %p299_p3, %p298_p2  ;;  %p304_p8 = scmp.lt.u32.totalorder %s302_s9, %s297_s6 }
  0x1a   : > { %p306_p9 = scmp.lt.u32.totalorder %s297_s6, %s478_s29 }
  0x1b   : > { %p301_p7 = pneg %p300_p4  ;;  %p305_p10 = por %p304_p8, %p303_p5 }
  0x1d   : > { %p307_p0 = por %p306_p9, %p305_p10 }
  0x1f   : > { %p308_p1 = pnand %p307_p0, %p301_p7 }
  0x21   : > { %311 = shalt.err (!%p308_p1)
}
  0x22   : > { %s312_s17 = scalar_lea.vmem %s486_s3, 128  ;;  %s395_s18 = smov [#allocation4]  }
  0x23   : > { %p313_p2 = scmp.ne.s32.totalorder %s486_s3, %s312_s17  ;;  %s317_s20 = sshll.u32 %s395_s18, 4  ;;  %s318_s20 = int_to_ptr.vmem [resolvable:$false] %s317_s20 }
  0x24   : > { %s319_s24 = scalar_lea.vmem %s318_s20, 256  ;;  %p320_p11 = scmp.lt.s32.totalorder %s486_s3, %s318_s20 }
  0x25   : > { %p315_p4 = pnand %p313_p2, %p299_p3  ;;  %p321_p5 = scmp.lt.s32.totalorder %s319_s24, %s312_s17 }
  0x27   : > { %p316_p12 = pneg %p315_p4  ;;  %p322_p8 = por %p321_p5, %p320_p11 }
  0x29   : > { %p323_p9 = pnand %p322_p8, %p316_p12 }
  0x2b   : > { %326 = shalt.err (!%p323_p9)
}
  0x2c   : > { %254 = dma.hbm_to_vmem [thread:$0]  (!%p482_p13), %s478_s29, 128, %s486_s3, %s90_s5  }
  0x2d   : > { %p585_p0 = scmp.lt.s32.totalorder %s393_s14, 3  ;;  %p586_p1 = scmp.ge.s32.totalorder %s393_s14, 1 }
  0x2f   : > { %p106_p3 = pnand %p586_p1, %p585_p0 }
  0x30   : > { %s520_s25 = sand.u32 (!%p106_p3), 1, %s385_s12  }
  0x31   : > { %109 = sbr.rel (%p106_p3) target bundleno = 398 (0x18e), region = 24  ;;  %s241_s26 = sshll.u32 (!%p106_p3), %s520_s25, 3 }
  0x32   : > { %s112_s27 = scalar_lea.sflag (!%p106_p3), [#allocation5], %s520_s25  ;;  %s115_s28 = scalar_lea.vmem (!%p106_p3), [#allocation4], %s241_s26 }
  0x38   : > { %372 = dma.done.wait (%p458_p6), %s112_s27, 128  }
  0x39   : > { %374 = vsyncadd (%p458_p6), %s112_s27, 4294967168  ;;  %s134_s30 = sld [smem:[#allocation3]]  ;;  %v135_v0 = vld [vmem:[%s115_s28] sm:$0xff]  ;;  %s244_s21 = sshll.u32 %s436_s0, 7 }
  0x3a   : > { %s133_s29 = scalar_lea.vmem [#allocation7], %s241_s26  ;;  %s532_s6 = scalar_lea.hbm %s578_s2, %s244_s21 }
  0x3b   : > { %s165_s3 = sshll.u32 %s133_s29, 4  ;;  %s152_s7 = scalar_lea.sflag [#allocation6], %s520_s25  ;;  %s534_s3 = int_to_ptr.vmem [resolvable:$true] %s165_s3 }
  0x3c   : > { %s327_s8 = scalar_lea.vmem %s534_s3, 128  ;;  %p587_p11 = scmp.ne.s32.totalorder %s582_s22, 0 }
  0x3d   : > { %p328_p6 = scmp.ne.s32.totalorder %s534_s3, %s327_s8  ;;  %s396_s0 = smov [#allocation7]  }
  0x3e   : > { %s331_s9 = sshll.u32 %s396_s0, 4  ;;  %s332_s9 = int_to_ptr.vmem [resolvable:$false] %s331_s9 }
  0x3f   : > { %v136_v1 = vstv %s134_s30  ;;  %p329_p12 = pnand %p328_p6, %p587_p11  ;;  %s333_s10 = scalar_lea.vmem %s332_s9, 256 }
  0x40   : > { %v137_v2 = vmul.f32 %v136_v1, %v135_v0  ;;  %p334_p7 = scmp.lt.s32.totalorder %s534_s3, %s332_s9  ;;  %p335_p10 = scmp.lt.s32.totalorder %s333_s10, %s327_s8 }
  0x41   : > { %p330_p13 = pneg %p329_p12 }
  0x42   : > { %138 = vmax.xlane.f32.xlu0 %v137_v2  ;;  %p336_p2 = por %p335_p10, %p334_p7 }
  0x44   : > { %p337_p4 = pnand %p336_p2, %p330_p13 }
  0xcf   : > { %v139_v3 = vpop.xlane.xlu0 %138 }
  0xd0   : > { %v140_v4 = vsub.f32 %v137_v2, %v139_v3 }
  0xd2   : > { %v141_v5 = vmul.f32 1.442695, %v140_v4 }
  0xd4   : > { %293 = vpow2.f32 %v141_v5 }
  0xde   : > { %v294_v6 = vpop.eup %293 }
  0xdf   : > { %143 = vadd.xlane.f32.xlu0 %v294_v6 }
 0x16c   : > { %v144_v7 = vpop.xlane.xlu0 %143 }
 0x16d   : > { %295 = vrcp.f32 %v144_v7 }
 0x177   : > { %v296_v8 = vpop.eup %295 }
 0x178   : > { %v146_v9 = vmul.f32 %v296_v8, %v144_v7 }
 0x17a   : > { %v147_v10 = vsub.f32 2.0, %v146_v9 }
 0x17c   : > { %v148_v11 = vmul.f32 %v296_v8, %v147_v10 }
 0x17e   : > { %v149_v12 = vmul.f32 %v294_v6, %v148_v11 }
 0x180   : > { %150 = vst [vmem:[%s133_s29] sm:$0xff] %v149_v12 }
 0x181   : > { %340 = shalt.err (!%p337_p4)
}
 0x182   : > { %s341_s15 = scalar_lea.hbm %s532_s6, 128  ;;  %s345_s20 = scalar_lea.hbm %s578_s2, 256 }
 0x183   : > { %p342_p5 = scmp.ne.s32.totalorder %s532_s6, %s341_s15  ;;  %p346_p0 = scmp.lt.u32.totalorder %s532_s6, %s578_s2 }
 0x184   : > { %p347_p1 = scmp.lt.u32.totalorder %s345_s20, %s341_s15  ;;  %p349_p6 = scmp.lt.u32.totalorder %s341_s15, %s532_s6 }
 0x185   : > { %p343_p8 = pnand %p342_p5, %p587_p11 }
 0x186   : > { %p348_p3 = por %p347_p1, %p346_p0 }
 0x187   : > { %p344_p9 = pneg %p343_p8 }
 0x188   : > { %p350_p12 = por %p349_p6, %p348_p3 }
 0x18a   : > { %p351_p13 = pnand %p350_p12, %p344_p9 }
 0x18c   : > { %354 = shalt.err (!%p351_p13)
}
 0x18d   : > { %249 = dma.vmem_to_hbm [thread:$0]  (%p587_p11), %s534_s3, 128, %s532_s6, %s152_s7  }
 0x18e PF: > { %s177_s26 = sand.u32 1, %s381_s11   ;;  %p588_p7 = scmp.ne.s32.totalorder %s583_s23, 0 }
 0x18f   : > { %p589_p10 = scmp.ge.s32.totalorder %s393_s14, 2  ;;  %s178_s27 = scalar_lea.sflag [#allocation6], %s177_s26 }
 0x191   : > { %p256_p2 = pnand %p589_p10, %p588_p7 }
 0x193   : > { %376 = dma.done.wait (!%p256_p2), %s178_s27, 128  }
 0x194   : > { %378 = vsyncadd (!%p256_p2), %s178_s27, 4294967168  ;;  %p16_p4 = scmp.ge.s32.totalorder %s440_s16, 4   ;;  %s590_s11 = smov %s385_s12 }
 0x195   : > { %s591_s12 = smov %s389_s13  ;;  %s592_s13 = smov %s452_s19 }
 0x196   : > { %s593_s14 = smov %s440_s16  ;;  %18 = sbr.rel (!%p16_p4) target bundleno = 7 (0x7), region = 69 }
 0x19d   :  { %183 = vsyncpa [#allocation5], 1 }
 0x19e   :  { %185 = vsyncpa [#allocation5 + $0x1], 1 }
 0x19f   :  { %186 = vsyncpa [#allocation6], 1 }
 0x1a0   :  { %188 = vsyncpa [#allocation6 + $0x1], 1 }

</bundles_post_ra>
